<compile_context>
chip_gen: v7x
topology: tpu7x:2x2x1
jax: 0.10.0
libtpu: 0.0.40
codegen_flags: <defaults>
</compile_context>

<pallas_src>
import jax
import jax.numpy as jnp
from jax.experimental import pallas as pl
from jax.experimental.pallas import tpu as pltpu


def _round_up(x, m):
    return ((x + m - 1) // m) * m


def _largest_divisor_leq(n, cap):
    cap = max(1, min(cap, n))
    for d in range(cap, 0, -1):
        if n % d == 0:
            return d
    return 1


def _block_vmem_bytes(shape, itemsize):
    """Conservative per-buffer VMEM footprint of a block, incl. sublane/lane padding."""
    if len(shape) == 1:
        return _round_up(max(shape[0], 1), 128) * itemsize
    lead = 1
    for d in shape[:-2]:
        lead *= max(d, 1)
    sublane = max(8, 32 // itemsize)
    rows = _round_up(max(shape[-2], 1), sublane)
    lanes = _round_up(max(shape[-1], 1), 128)
    return lead * rows * lanes * itemsize


def _seq_regression_kernel(feat_ref, mask_ref, inv_ref, w1_ref, b1_ref,
                           w2_ref, b2_ref, logits_ref, acc_ref):
    """Grid = (batch tiles, seq tiles); seq (last grid axis) is the reduction."""
    l = pl.program_id(1)

    @pl.when(l == 0)
    def _init():
        acc_ref[...] = jnp.zeros_like(acc_ref)

    # Masked pooling partial sums on the MXU: per batch row, the (1, Lt) mask
    # is contracted with the (Lt, H) feature tile -> (1, H), accumulated in
    # f32.  The batch tile is a small static int, so this unrolls into plain
    # 2-D MXU matmuls (keeps the MAC off the VPU without batched dot_general).
    b_tile = feat_ref.shape[0]
    for bi in range(b_tile):
        acc_ref[pl.ds(bi, 1), :] += jnp.dot(
            mask_ref[bi], feat_ref[bi], preferred_element_type=jnp.float32)

    @pl.when(l == pl.num_programs(1) - 1)
    def _finalize():
        inv = inv_ref[...][:, 0, :]                      # (Bt, 1) f32, 1/num_tokens
        pooled = acc_ref[...] * inv                      # (Bt, H) masked mean
        # Regression head: Linear -> ReLU -> Dropout -> Linear.
        h = jnp.dot(pooled, w1_ref[...],
                    preferred_element_type=jnp.float32) + b1_ref[...]
        h = jnp.maximum(h, 0.0)
        # TODO(synk): nn.Dropout is identity at inference; training-mode dropout
        # (pltpu.prng_seed + Bernoulli mask with 1/(1-p) scaling) not implemented.
        logits = jnp.dot(h, w2_ref[...],
                         preferred_element_type=jnp.float32) + b2_ref[...]
        logits_ref[...] = logits[:, None, :].astype(logits_ref.dtype)


def sequence_regression_forward(feature, attention_mask, w1, b1, w2, b2, targets):
    """Returns ((loss, metrics), logits), matching the PyTorch module outputs.

    feature:        [B, L, H] PLM last hidden state (bf16 or f32).
    attention_mask: [B, L]    1 for real tokens, 0 for padding.
    """
    B, L, H = feature.shape
    HID = w1.shape[1]
    NL = w2.shape[1]
    itemsize = jnp.dtype(feature.dtype).itemsize

    # --- generation-aware VMEM budget ----------------------------------------
    try:
        info = pltpu.get_tpu_info()
        vmem_cap = int(getattr(info, "vmem_capacity_bytes", 0) or (64 << 20))
    except Exception:
        vmem_cap = 64 << 20
    vmem_cap = max(vmem_cap, 32 << 20)
    # ~12.8 MiB/buffer on v7x (64 MiB VMEM), capped at 24 MiB on v5e/v6e (128 MiB).
    feat_tile_bytes = int(min(24 << 20, max(2 << 20, vmem_cap // 5)))

    # --- batch tiling: B_TILE always divides B (no batch padding, no copies) --
    B_TILE = _largest_divisor_leq(B, 8)
    if B >= 2 and B // B_TILE < 2:
        # v7x megacore: keep >= 2 batch tiles so both TensorCores get work.
        B_TILE = _largest_divisor_leq(B, B // 2)

    # --- sequence tiling: avoid any full-feature pad --------------------------
    # L_TILE must be a multiple of 128 (mask lane dim; also covers bf16 sublane
    # packing of 16) that divides L, or the full L extent.  Padding L (one
    # extra HBM pass over the feature) is a last-resort fallback only.
    per_row = max(B_TILE * H * itemsize, 1)
    max_lt = max(128, feat_tile_bytes // per_row)
    L_TILE = None
    d = (min(max_lt, L) // 128) * 128
    while d >= 128:
        if L % d == 0:
            L_TILE = d
            break
        d -= 128
    L_pad = L
    if L_TILE is None:
        if B_TILE * L * H * itemsize <= feat_tile_bytes:
            L_TILE = L                          # full-extent seq tile, no pad
        else:
            L_pad = _round_up(L, 128)           # rare fallback: light L pad (full copy)
            L_TILE = 128
            d = (min(max_lt, L_pad) // 128) * 128
            while d >= 128:
                if L_pad % d == 0:
                    L_TILE = d
                    break
                d -= 128

    # --- wrapper-side prep (no full-tensor copies on the common path) ---------
    mask_f32 = attention_mask.astype(jnp.float32)
    num_tokens = jnp.maximum(jnp.sum(mask_f32, axis=1, keepdims=True), 1.0)
    inv_tokens = (1.0 / num_tokens).reshape(B, 1, 1)            # [B,1,1] f32
    mask = attention_mask.astype(feature.dtype)                 # [B, L], 0/1 exact in bf16
    feat = feature
    if L_pad != L:
        feat = jnp.pad(feat, ((0, 0), (0, L_pad - L), (0, 0)))
        mask = jnp.pad(mask, ((0, 0), (0, L_pad - L)))
    mask3 = mask.reshape(B, 1, L_pad)                           # free reshape: L on lanes

    grid = (B // B_TILE, L_pad // L_TILE)

    # --- VMEM accounting: double-buffered inputs/outputs + f32 accumulator ----
    vmem_bytes = (
        2 * (_block_vmem_bytes((B_TILE, L_TILE, H), itemsize)       # feature
             + _block_vmem_bytes((B_TILE, 1, L_TILE), itemsize)     # mask
             + _block_vmem_bytes((B_TILE, 1, 1), 4)                 # 1/num_tokens
             + _block_vmem_bytes((H, HID), 4)                       # w1
             + _block_vmem_bytes((1, HID), 4)                       # b1
             + _block_vmem_bytes((HID, NL), 4)                      # w2
             + _block_vmem_bytes((1, NL), 4)                        # b2
             + _block_vmem_bytes((B_TILE, 1, NL), 4))               # logits out
        + _block_vmem_bytes((B_TILE, H), 4))                        # accumulator scratch
    vmem_limit = max(int(1.25 * vmem_bytes) + (2 << 20), 16 << 20)
    vmem_limit = min(vmem_limit, vmem_cap - (4 << 20))

    # NOTE: the constant-index weight blocks (w1/b1/w2/b2) could additionally be
    # marked pipeline_mode=pl.Buffered(1) and passed as bf16 to halve their
    # (already small) VMEM share; kept f32/default here for exact parity with
    # the PyTorch head.
    logits3 = pl.pallas_call(
        _seq_regression_kernel,
        out_shape=jax.ShapeDtypeStruct((B, 1, NL), jnp.float32),
        grid_spec=pltpu.PrefetchScalarGridSpec(
            num_scalar_prefetch=0,
            grid=grid,
            in_specs=[
                pl.BlockSpec((B_TILE, L_TILE, H), lambda b, l: (b, l, 0)),   # feature
                pl.BlockSpec((B_TILE, 1, L_TILE), lambda b, l: (b, 0, l)),   # mask
                pl.BlockSpec((B_TILE, 1, 1), lambda b, l: (b, 0, 0)),        # 1/num_tokens
                pl.BlockSpec((H, HID), lambda b, l: (0, 0)),                 # w1 (resident)
                pl.BlockSpec((1, HID), lambda b, l: (0, 0)),                 # b1
                pl.BlockSpec((HID, NL), lambda b, l: (0, 0)),                # w2
                pl.BlockSpec((1, NL), lambda b, l: (0, 0)),                  # b2
            ],
            out_specs=pl.BlockSpec((B_TILE, 1, NL), lambda b, l: (b, 0, 0)),
            scratch_shapes=[pltpu.VMEM((B_TILE, H), jnp.float32)],
        ),
        compiler_params=pltpu.CompilerParams(
            dimension_semantics=("parallel", "arbitrary"),
            vmem_limit_bytes=vmem_limit,
        ),
    )(feat, mask3, inv_tokens,
      w1, b1.reshape(1, HID), w2, b2.reshape(1, NL))

    logits = logits3.reshape(B, NL)

    # MSE loss finished in the wrapper (trivial [B, NL] op).
    loss = jnp.mean((logits - targets.astype(jnp.float32)) ** 2)
    metrics = {}
    return (loss, metrics), logits


def _reference(feature, attention_mask, w1, b1, w2, b2, targets):
    feat = feature.astype(jnp.float32)
    mask = attention_mask.astype(jnp.float32)
    n = jnp.maximum(mask.sum(1, keepdims=True), 1.0)
    pooled = (feat * mask[:, :, None]).sum(1) / n
    h = jnp.maximum(pooled @ w1 + b1, 0.0)
    logits = h @ w2 + b2
    loss = jnp.mean((logits - targets) ** 2)
    return loss, logits


if __name__ == "__main__":
    key = jax.random.PRNGKey(0)
    B, L, H, HID, NL = 2, 8, 32, 512, 1   # lm_hidden_size=32, head hidden=512, num_labels=1

    k0, k1, k2, k3, k4, k5 = jax.random.split(key, 6)
    # Synthetic stand-in for the PLM last hidden state [B, L, H], fed in bf16.
    feature = jax.random.normal(k0, (B, L, H), jnp.float32).astype(jnp.bfloat16)
    # Ragged attention mask (second sequence has 2 padded positions).
    lengths = jnp.array([[L], [L - 2]], dtype=jnp.int32)
    attention_mask = (jnp.arange(L)[None, :] < lengths).astype(jnp.float32)

    # Deterministic head parameters (shapes from SequenceRegressionHead(H, 512, NL)).
    w1 = jax.random.normal(k1, (H, HID), jnp.float32) * (1.0 / jnp.sqrt(H))
    b1 = jax.random.normal(k2, (HID,), jnp.float32) * 0.01
    w2 = jax.random.normal(k3, (HID, NL), jnp.float32) * (1.0 / jnp.sqrt(HID))
    b2 = jax.random.normal(k4, (NL,), jnp.float32) * 0.01
    targets = jax.random.normal(k5, (B, NL), jnp.float32)

    (loss, _metrics), logits = sequence_regression_forward(
        feature, attention_mask, w1, b1, w2, b2, targets)
    jax.block_until_ready((loss, logits))

    ref_loss, ref_logits = _reference(feature, attention_mask, w1, b1, w2, b2, targets)
    assert jnp.allclose(logits, ref_logits, atol=1e-4, rtol=1e-4)
    assert jnp.allclose(loss, ref_loss, atol=1e-4, rtol=1e-4)

    print("KERNEL_OK")
</pallas_src>

<mosaic_0001>
module attributes {stable_mosaic.version = 11 : i64} {
  func.func @_seq_regression_kernel(%arg0: i32, %arg1: i32, %arg2: memref<1x8x32xbf16, #tpu.memory_space<vmem>>, %arg3: memref<1x1x8xbf16, #tpu.memory_space<vmem>>, %arg4: memref<1x1x1xf32, #tpu.memory_space<vmem>>, %arg5: memref<32x512xf32, #tpu.memory_space<vmem>>, %arg6: memref<1x512xf32, #tpu.memory_space<vmem>>, %arg7: memref<512x1xf32, #tpu.memory_space<vmem>>, %arg8: memref<1x1xf32, #tpu.memory_space<vmem>>, %arg9: memref<1x1x1xf32, #tpu.memory_space<vmem>>, %arg10: memref<1x32xf32, #tpu.memory_space<vmem>>) attributes {dimension_semantics = [#tpu.dimension_semantics<parallel>, #tpu.dimension_semantics<arbitrary>], iteration_bounds = array<i64: 2, 1>, scalar_prefetch = 0 : i64, scratch_operands = 1 : i64, tpu.core_type = #tpu.core_type<tc>, window_params = [{transform_indices = @transform_0, window_bounds = array<i64: 1, 8, 32>}, {transform_indices = @transform_1, window_bounds = array<i64: 1, 1, 8>}, {transform_indices = @transform_2, window_bounds = array<i64: 1, 1, 1>}, {pipeline_mode = #tpu.pipeline_mode<synchronous>, transform_indices = @transform_3, window_bounds = array<i64: 32, 512>}, {pipeline_mode = #tpu.pipeline_mode<synchronous>, transform_indices = @transform_4, window_bounds = array<i64: 1, 512>}, {pipeline_mode = #tpu.pipeline_mode<synchronous>, transform_indices = @transform_5, window_bounds = array<i64: 512, 1>}, {pipeline_mode = #tpu.pipeline_mode<synchronous>, transform_indices = @transform_6, window_bounds = array<i64: 1, 1>}, {transform_indices = @transform_7, window_bounds = array<i64: 1, 1, 1>}]} {
    %c0_i32 = arith.constant 0 : i32
    %0 = arith.cmpi eq, %arg1, %c0_i32 : i32
    %1 = arith.extui %0 : i1 to i32
    %c0_i32_0 = arith.constant 0 : i32
    %2 = arith.cmpi ne, %1, %c0_i32_0 : i32
    scf.if %2 {
      %cst_12 = arith.constant 0.000000e+00 : f32
      %14 = vector.broadcast %cst_12 : f32 to vector<1x32xf32>
      %c0_13 = arith.constant 0 : index
      %c0_14 = arith.constant 0 : index
      %15 = vector.load %arg10[%c0_13, %c0_14] : memref<1x32xf32, #tpu.memory_space<vmem>>, vector<1x32xf32>
      tpu.vector_store %arg10[%c0_13, %c0_14], %14 {strides = array<i32>} : memref<1x32xf32, #tpu.memory_space<vmem>>, vector<1x32xf32>,
    } else {
    }
    %c0 = arith.constant 0 : index
    %c0_1 = arith.constant 0 : index
    %3 = vector.load %arg10[%c0, %c0_1] : memref<1x32xf32, #tpu.memory_space<vmem>>, vector<1x32xf32>
    %c0_2 = arith.constant 0 : index
    %c0_3 = arith.constant 0 : index
    %c0_4 = arith.constant 0 : index
    %4 = vector.load %arg3[%c0_2, %c0_3, %c0_4] : memref<1x1x8xbf16, #tpu.memory_space<vmem>>, vector<1x1x8xbf16>
    %5 = vector.shape_cast %4 : vector<1x1x8xbf16> to vector<1x8xbf16>
    %c0_5 = arith.constant 0 : index
    %c0_6 = arith.constant 0 : index
    %c0_7 = arith.constant 0 : index
    %6 = vector.load %arg2[%c0_5, %c0_6, %c0_7] : memref<1x8x32xbf16, #tpu.memory_space<vmem>>, vector<1x8x32xbf16>
    %7 = vector.shape_cast %6 : vector<1x8x32xbf16> to vector<8x32xbf16>
    %cst = arith.constant dense<0.000000e+00> : vector<1x32xf32>
    %8 = tpu.matmul %5, %7, %cst {dimension_numbers = #tpu.dot_dimension_numbers<[1], [0], [0], [1], [0, 0, 1, 1], [], []>} : vector<1x8xbf16>, vector<8x32xbf16>, vector<1x32xf32> -> vector<1x32xf32>
    %9 = arith.addf %3, %8 : vector<1x32xf32>
    %c0_8 = arith.constant 0 : index
    %c0_9 = arith.constant 0 : index
    %10 = vector.load %arg10[%c0_8, %c0_9] : memref<1x32xf32, #tpu.memory_space<vmem>>, vector<1x32xf32>
    tpu.vector_store %arg10[%c0_8, %c0_9], %9 {strides = array<i32>} : memref<1x32xf32, #tpu.memory_space<vmem>>, vector<1x32xf32>,
    %c0_i32_10 = arith.constant 0 : i32
    %11 = arith.cmpi eq, %arg1, %c0_i32_10 : i32
    %12 = arith.extui %11 : i1 to i32
    %c0_i32_11 = arith.constant 0 : i32
    %13 = arith.cmpi ne, %12, %c0_i32_11 : i32
    scf.if %13 {
      %c0_12 = arith.constant 0 : index
      %c0_13 = arith.constant 0 : index
      %c0_14 = arith.constant 0 : index
      %14 = vector.load %arg4[%c0_12, %c0_13, %c0_14] : memref<1x1x1xf32, #tpu.memory_space<vmem>>, vector<1x1x1xf32>
      %15 = vector.shape_cast %14 : vector<1x1x1xf32> to vector<1x1xf32>
      %c0_15 = arith.constant 0 : index
      %c0_16 = arith.constant 0 : index
      %16 = vector.load %arg10[%c0_15, %c0_16] : memref<1x32xf32, #tpu.memory_space<vmem>>, vector<1x32xf32>
      %17 = vector.broadcast %15 : vector<1x1xf32> to vector<1x32xf32>
      %18 = arith.mulf %16, %17 : vector<1x32xf32>
      %c0_17 = arith.constant 0 : index
      %c0_18 = arith.constant 0 : index
      %19 = vector.load %arg5[%c0_17, %c0_18] : memref<32x512xf32, #tpu.memory_space<vmem>>, vector<32x512xf32>
      %cst_19 = arith.constant dense<0.000000e+00> : vector<1x512xf32>
      %20 = tpu.matmul %18, %19, %cst_19 {dimension_numbers = #tpu.dot_dimension_numbers<[1], [0], [0], [1], [0, 0, 1, 1], [], []>} : vector<1x32xf32>, vector<32x512xf32>, vector<1x512xf32> -> vector<1x512xf32>
      %c0_20 = arith.constant 0 : index
      %c0_21 = arith.constant 0 : index
      %21 = vector.load %arg6[%c0_20, %c0_21] : memref<1x512xf32, #tpu.memory_space<vmem>>, vector<1x512xf32>
      %22 = arith.addf %20, %21 : vector<1x512xf32>
      %cst_22 = arith.constant 0.000000e+00 : f32
      %23 = vector.broadcast %cst_22 : f32 to vector<1x512xf32>
      %24 = arith.maximumf %22, %23 : vector<1x512xf32>
      %c0_23 = arith.constant 0 : index
      %c0_24 = arith.constant 0 : index
      %25 = vector.load %arg7[%c0_23, %c0_24] : memref<512x1xf32, #tpu.memory_space<vmem>>, vector<512x1xf32>
      %cst_25 = arith.constant dense<0.000000e+00> : vector<1x1xf32>
      %26 = tpu.matmul %24, %25, %cst_25 {dimension_numbers = #tpu.dot_dimension_numbers<[1], [0], [0], [1], [0, 0, 1, 1], [], []>} : vector<1x512xf32>, vector<512x1xf32>, vector<1x1xf32> -> vector<1x1xf32>
      %c0_26 = arith.constant 0 : index
      %c0_27 = arith.constant 0 : index
      %27 = vector.load %arg8[%c0_26, %c0_27] : memref<1x1xf32, #tpu.memory_space<vmem>>, vector<1x1xf32>
      %28 = arith.addf %26, %27 : vector<1x1xf32>
      %29 = vector.shape_cast %28 : vector<1x1xf32> to vector<1x1x1xf32>
      %c0_28 = arith.constant 0 : index
      %c0_29 = arith.constant 0 : index
      %c0_30 = arith.constant 0 : index
      %30 = vector.load %arg9[%c0_28, %c0_29, %c0_30] : memref<1x1x1xf32, #tpu.memory_space<vmem>>, vector<1x1x1xf32>
      tpu.vector_store %arg9[%c0_28, %c0_29, %c0_30], %29 {strides = array<i32>} : memref<1x1x1xf32, #tpu.memory_space<vmem>>, vector<1x1x1xf32>,
    } else {
    }
    return
  }
  func.func @transform_0(%arg0: i32, %arg1: i32) -> (i32, i32, i32) {
    %c0_i32 = arith.constant 0 : i32
    %c0_i32_0 = arith.constant 0 : i32
    return %arg0, %arg1, %c0_i32 : i32, i32, i32
  }
  func.func @transform_1(%arg0: i32, %arg1: i32) -> (i32, i32, i32) {
    %c0_i32 = arith.constant 0 : i32
    %c0_i32_0 = arith.constant 0 : i32
    return %arg0, %c0_i32, %arg1 : i32, i32, i32
  }
  func.func @transform_2(%arg0: i32, %arg1: i32) -> (i32, i32, i32) {
    %c0_i32 = arith.constant 0 : i32
    %c0_i32_0 = arith.constant 0 : i32
    %c0_i32_1 = arith.constant 0 : i32
    return %arg0, %c0_i32, %c0_i32_0 : i32, i32, i32
  }
  func.func @transform_3(%arg0: i32, %arg1: i32) -> (i32, i32) {
    %c0_i32 = arith.constant 0 : i32
    %c0_i32_0 = arith.constant 0 : i32
    %c0_i32_1 = arith.constant 0 : i32
    return %c0_i32, %c0_i32_0 : i32, i32
  }
  func.func @transform_4(%arg0: i32, %arg1: i32) -> (i32, i32) {
    %c0_i32 = arith.constant 0 : i32
    %c0_i32_0 = arith.constant 0 : i32
    %c0_i32_1 = arith.constant 0 : i32
    return %c0_i32, %c0_i32_0 : i32, i32
  }
  func.func @transform_5(%arg0: i32, %arg1: i32) -> (i32, i32) {
    %c0_i32 = arith.constant 0 : i32
    %c0_i32_0 = arith.constant 0 : i32
    %c0_i32_1 = arith.constant 0 : i32
    return %c0_i32, %c0_i32_0 : i32, i32
  }
  func.func @transform_6(%arg0: i32, %arg1: i32) -> (i32, i32) {
    %c0_i32 = arith.constant 0 : i32
    %c0_i32_0 = arith.constant 0 : i32
    %c0_i32_1 = arith.constant 0 : i32
    return %c0_i32, %c0_i32_0 : i32, i32
  }
  func.func @transform_7(%arg0: i32, %arg1: i32) -> (i32, i32, i32) {
    %c0_i32 = arith.constant 0 : i32
    %c0_i32_0 = arith.constant 0 : i32
    %c0_i32_1 = arith.constant 0 : i32
    return %arg0, %c0_i32, %c0_i32_0 : i32, i32, i32
  }
}

</mosaic_0001>

<bundles_post_ra>
// kernel: tpu_custom_call.1
= control target key start
LH: loop header
LB: loop body
LE: loop exit
PB: predicated region body
PF: predicated region fallthrough
CT: control target
= control target key end

     0   :  { %s1153_s26 = smov 0   ;;  %s1155_s27 = smov 0   ;;  %s1453_s0 = inlined_call_operand.vmem [shape: bf16[2,8,32], index: 0, kind: input, shape index: {}]   ;;  %s1454_s1 = inlined_call_operand.vmem [shape: bf16[2,1,8], index: 1, kind: input, shape index: {}]   ;;  %s1455_s2 = inlined_call_operand.vmem [shape: f32[2,1,1], index: 2, kind: input, shape index: {}]   ;;  %s1456_s3 = inlined_call_operand.vmem [shape: f32[32,512], index: 3, kind: input, shape index: {}]   ;;  %s1457_s4 = inlined_call_operand.vmem [shape: f32[1,512], index: 4, kind: input, shape index: {}]   ;;  %s1458_s5 = inlined_call_operand.vmem [shape: f32[512,1], index: 5, kind: input, shape index: {}]   ;;  %s1459_s6 = inlined_call_operand.<no memory space> [shape: f32[1,1], index: 6, kind: input, shape index: {}]   ;;  %s1460_s7 = inlined_call_operand.vmem [shape: f32[2,1,1], index: 7, kind: output, shape index: {}]  }
   0x1   :  { %v12_v0 = vstv %s1459_s6  ;;  %s1157_s28 = smov 0  }
   0x2   :  { %13 = vst [vmem:[#allocation3] sm:$0x1] %v12_v0 }
   0x3 LB: > { %s31_s6 = sadd.s32 1, %s1101_s27  ;;  %p890_p0 = scmp.ge.s32.totalorder %s1105_s28, 1  ;;  %s1105_s28 = sphi %s1157_s28, %s19_s28   ;;  %s1101_s27 = sphi %s1155_s27, %s1462_s27   ;;  %s1097_s26 = sphi %s1153_s26, %s1461_s26  }
   0x4   : > { %p33_p1 = scmp.ge.s32.totalorder %s31_s6, 2  ;;  %p276_p2 = scmp.lt.s32.totalorder %s1105_s28, 3 }
   0x6   : > { %s1464_s6 = smov (%p33_p1, %s31_s6), 0  ;;  %p277_p3 = pnand %p890_p0, %p276_p2 }
   0x7   : > { %p317_p4 = scmp.lt.s32.totalorder (!%p277_p3), %s1097_s26, 1  ;;  %v1107_v1 = vmov (!%p277_p3), 0.0   ;;  %vm1108_vm0 = vmmov (!%p277_p3), 0   ;;  %vm341_vm1 = vcmask (!%p277_p3), 253952   ;;  %v1109_v2 = vmov (!%p277_p3), 0   ;;  %v413_v7 = vld [vmem:[%s1456_s3 + $0x8] sm:$0xff] (!%p277_p3) }
   0x8   : > { %280 = sbr.rel (%p277_p3) target bundleno = 685 (0x2ad), region = 48  ;;  %969 = vmatprep.subr.bf16.mxu0 (!%p277_p3), %v1107_v1  ;;  %971 = vmatprep.mubr.msk.bf16.mxu0 (!%p277_p3), %vm1108_vm0, %v1107_v1  ;;  %342 = vst.msk [vmem:[#allocation2] sm:$0x1] (!%p277_p3), %vm341_vm1, %v1107_v1  ;;  %vm350_vm2 = vcmask (!%p277_p3), 1043456   ;;  %vm346_vm3 = vcmask (!%p277_p3), 64512   ;;  %v417_v8 = vld [vmem:[%s1456_s3 + $0x28] sm:$0xff] (!%p277_p3)  ;;  %v407_v37 = vlaneseq (!%p277_p3) }
   0x9   : > { %1082 = vset.pattern.permute.xlu0 (!%p277_p3), %v1109_v2  ;;  %518 = vmatprep.mubr.f32.mxu1 (!%p277_p3), %v1107_v1  ;;  %v415_v9 = vld [vmem:[%s1456_s3 + $0x18] sm:$0xff] (!%p277_p3)  ;;  %v975_v10 = vpack.c.bf16 (!%p277_p3), %v417_v8, %v413_v7  ;;  %v412_v12 = vld [vmem:[%s1456_s3] sm:$0xff] (!%p277_p3)  ;;  %v414_v16 = vld [vmem:[%s1456_s3 + $0x10] sm:$0xff] (!%p277_p3)  ;;  %vm450_vm4 = vcmask (!%p277_p3), 261120   ;;  %vm805_vm5 = vcmask (!%p277_p3), 0  }
   0xa   : > { %v419_v11 = vld [vmem:[%s1456_s3 + $0x38] sm:$0xff] (!%p277_p3)  ;;  %v416_v13 = vld [vmem:[%s1456_s3 + $0x20] sm:$0xff] (!%p277_p3)  ;;  %v418_v17 = vld [vmem:[%s1456_s3 + $0x30] sm:$0xff] (!%p277_p3)  ;;  %v1246_v39 = vshrl.u32 (!%p277_p3), %v407_v37, 7 }
   0xb   : > { %v983_v14 = vpack.c.bf16 (!%p277_p3), %v419_v11, %v415_v9  ;;  %v977_v15 = vpack.c.bf16 (!%p277_p3), %v416_v13, %v412_v12  ;;  %976 = vmatprep.subr.bf16.mxu1 (!%p277_p3), %v975_v10  ;;  %v985_v18 = vpack.c.bf16 (!%p277_p3), %v418_v17, %v414_v16  ;;  %v421_v19 = vld [vmem:[%s1456_s3 + $0x48] sm:$0xff] (!%p277_p3)  ;;  %v423_v21 = vld [vmem:[%s1456_s3 + $0x58] sm:$0xff] (!%p277_p3)  ;;  %v420_v24 = vld [vmem:[%s1456_s3 + $0x40] sm:$0xff] (!%p277_p3) }
   0xc   : > { %v425_v20 = vld [vmem:[%s1456_s3 + $0x68] sm:$0xff] (!%p277_p3)  ;;  %v427_v23 = vld [vmem:[%s1456_s3 + $0x78] sm:$0xff] (!%p277_p3)  ;;  %v424_v25 = vld [vmem:[%s1456_s3 + $0x60] sm:$0xff] (!%p277_p3)  ;;  %v409_v45 = vsub.s32 (!%p277_p3), 0, %v1246_v39 }
   0xd   : > { %978 = vmatpush1.bf16.msra.mxu1 (!%p277_p3), %v977_v15  ;;  %v979_v22 = vpack.c.bf16 (!%p277_p3), %v425_v20, %v421_v19  ;;  %v987_v26 = vpack.c.bf16 (!%p277_p3), %v427_v23, %v423_v21  ;;  %v981_v27 = vpack.c.bf16 (!%p277_p3), %v424_v25, %v420_v24  ;;  %v422_v28 = vld [vmem:[%s1456_s3 + $0x50] sm:$0xff] (!%p277_p3)  ;;  %v616_v31 = vld [vmem:[%s1458_s5 + $0x80] sm:$0xff] (!%p277_p3)  ;;  %v617_v32 = vld [vmem:[%s1458_s5 + $0x88] sm:$0xff] (!%p277_p3) }
   0xe   : > { %v426_v29 = vld [vmem:[%s1456_s3 + $0x70] sm:$0xff] (!%p277_p3)  ;;  %v648_v33 = vld [vmem:[%s1458_s5 + $0x180] sm:$0xff] (!%p277_p3)  ;;  %v991_v34 = vpack.c.bf16 (!%p277_p3), %v617_v32, %v616_v31  ;;  %v649_v35 = vld [vmem:[%s1458_s5 + $0x188] sm:$0xff] (!%p277_p3) }
   0xf   : > { %s1466_s26 = smov (!%p317_p4, %s1097_s26), 1  ;;  %980 = vmatprep.subr.bf16.mxu1 %v979_v22  ;;  %v989_v30 = vpack.c.bf16 %v426_v29, %v422_v28  ;;  %v1023_v36 = vpack.c.bf16 %v649_v35, %v648_v33  ;;  %v343_v38 = vld [vmem:[#allocation2] sm:$0x1]  ;;  %v601_v48 = vld [vmem:[%s1458_s5 + $0x8] sm:$0xff]  ;;  %v618_v52 = vld [vmem:[%s1458_s5 + $0x90] sm:$0xff] }
  0x10   : > { %s891_s29 = sshll.u32 %s1466_s26, 2  ;;  %s329_s9 = scalar_lea.vmem %s1454_s1, %s1466_s26  ;;  %v600_v47 = vld [vmem:[%s1458_s5] sm:$0xff]  ;;  %v633_v51 = vld [vmem:[%s1458_s5 + $0x108] sm:$0xff]  ;;  %v619_v53 = vld [vmem:[%s1458_s5 + $0x98] sm:$0xff] }
  0x11   : > { %s323_s12 = scalar_lea.vmem %s1453_s0, %s891_s29  ;;  %s332_s15 = scalar_lea.vmem %s1455_s2, %s1466_s26  ;;  %v344_v6 = vld [vmem:[%s329_s9] sm:$0x1]  ;;  %982 = vmatpush1.bf16.msra.mxu1 %v981_v27  ;;  %v650_v54 = vld [vmem:[%s1458_s5 + $0x190] sm:$0xff]  ;;  %v651_v55 = vld [vmem:[%s1458_s5 + $0x198] sm:$0xff]  ;;  %v993_v57 = vpack.c.bf16 %v601_v48, %v600_v47  ;;  %v995_v62 = vpack.c.bf16 %v619_v53, %v618_v52 }
  0x12   : > { %v345_v3 = vld [vmem:[%s323_s12] sm:$0xf]  ;;  %992 = vmatprep.subr.bf16.mxu1 %v991_v34  ;;  %v602_v59 = vld [vmem:[%s1458_s5 + $0x10] sm:$0xff]  ;;  %v603_v60 = vld [vmem:[%s1458_s5 + $0x18] sm:$0xff]  ;;  %v1027_v63 = vpack.c.bf16 %v651_v55, %v650_v54  ;;  %s335_s20 = scalar_lea.vmem %s1460_s7, %s1466_s26 }
  0x13   : > { %v400_v4 = vld [vmem:[%s332_s15] sm:$0x1]  ;;  %v352_v5 = vsel %vm350_vm2, %v345_v3, 0  ;;  %v634_v0 = vld [vmem:[%s1458_s5 + $0x110] sm:$0xff]  ;;  %v621_v3 = vld [vmem:[%s1458_s5 + $0xa8] sm:$0xff] }
  0x14   : > { %404 = vperm.xlu0 %1082, %v400_v4   ;;  %970 = vmatpush3.bf16.msra.mxu0 %v352_v5  ;;  %v632_v50 = vld [vmem:[%s1458_s5 + $0x100] sm:$0xff]  ;;  %v653_v5 = vld [vmem:[%s1458_s5 + $0x1a8] sm:$0xff]  ;;  %v623_v15 = vld [vmem:[%s1458_s5 + $0xb8] sm:$0xff] }
  0x15   : > { %984 = vmatprep.subr.bf16.mxu0 %v983_v14  ;;  %v1025_v58 = vpack.c.bf16 %v633_v51, %v632_v50  ;;  %v620_v2 = vld [vmem:[%s1458_s5 + $0xa0] sm:$0xff]  ;;  %v605_v9 = vld [vmem:[%s1458_s5 + $0x28] sm:$0xff]  ;;  %v622_v14 = vld [vmem:[%s1458_s5 + $0xb0] sm:$0xff] }
  0x16   : > { %v652_v4 = vld [vmem:[%s1458_s5 + $0x1a0] sm:$0xff]  ;;  %v999_v10 = vpack.c.bf16 %v621_v3, %v620_v2  ;;  %v637_v13 = vld [vmem:[%s1458_s5 + $0x128] sm:$0xff]  ;;  %v654_v16 = vld [vmem:[%s1458_s5 + $0x1b0] sm:$0xff]  ;;  %v1003_v22 = vpack.c.bf16 %v623_v15, %v622_v14  ;;  %v440_v14 = vsub.s32 2, %v1246_v39 }
  0x17   : > { %972 = vmatmul.mubr.msk.bf16.vlgmr.msra.gmra.mrb[0].mxu0 %vm346_vm3, %v344_v6  ;;  %v997_v6 = vpack.c.bf16 %v603_v60, %v602_v59  ;;  %v604_v8 = vld [vmem:[%s1458_s5 + $0x20] sm:$0xff]  ;;  %v1031_v11 = vpack.c.bf16 %v653_v5, %v652_v4  ;;  %v655_v17 = vld [vmem:[%s1458_s5 + $0x1b8] sm:$0xff]  ;;  %v606_v20 = vld [vmem:[%s1458_s5 + $0x30] sm:$0xff] }
  0x18   : > { %589 = vmatprep.mubr.f32.mxu0 %v1107_v1  ;;  %986 = vmatpush1.bf16.msra.mxu0 %v985_v18  ;;  %v635_v1 = vld [vmem:[%s1458_s5 + $0x118] sm:$0xff]  ;;  %v636_v12 = vld [vmem:[%s1458_s5 + $0x120] sm:$0xff]  ;;  %v1001_v18 = vpack.c.bf16 %v605_v9, %v604_v8  ;;  %v1035_v23 = vpack.c.bf16 %v655_v17, %v654_v16  ;;  %v638_v24 = vld [vmem:[%s1458_s5 + $0x130] sm:$0xff]  ;;  %v436_v16 = vsub.s32 1, %v1246_v39  ;;  %v444_v17 = vsub.s32 3, %v1246_v39 }
  0x19   : > { %988 = vmatprep.subr.bf16.mxu0 %v987_v26  ;;  %v1029_v7 = vpack.c.bf16 %v635_v1, %v634_v0  ;;  %v1033_v19 = vpack.c.bf16 %v637_v13, %v636_v12  ;;  %v607_v21 = vld [vmem:[%s1458_s5 + $0x38] sm:$0xff]  ;;  %v624_v26 = vld [vmem:[%s1458_s5 + $0xc0] sm:$0xff]  ;;  %v625_v27 = vld [vmem:[%s1458_s5 + $0xc8] sm:$0xff] }
  0x1a   : > { %v639_v25 = vld [vmem:[%s1458_s5 + $0x138] sm:$0xff]  ;;  %v656_v28 = vld [vmem:[%s1458_s5 + $0x1c0] sm:$0xff]  ;;  %v657_v29 = vld [vmem:[%s1458_s5 + $0x1c8] sm:$0xff]  ;;  %v1007_v34 = vpack.c.bf16 %v625_v27, %v624_v26 }
  0x1b   : > { %v1037_v31 = vpack.c.bf16 %v639_v25, %v638_v24  ;;  %v608_v32 = vld [vmem:[%s1458_s5 + $0x40] sm:$0xff]  ;;  %v609_v33 = vld [vmem:[%s1458_s5 + $0x48] sm:$0xff]  ;;  %v1039_v35 = vpack.c.bf16 %v657_v29, %v656_v28  ;;  %v611_v47 = vld [vmem:[%s1458_s5 + $0x58] sm:$0xff] }
  0x1c   : > { %990 = vmatpush1.bf16.msra.mxu0 %v989_v30  ;;  %v1005_v30 = vpack.c.bf16 %v607_v21, %v606_v20  ;;  %v641_v37 = vld [vmem:[%s1458_s5 + $0x148] sm:$0xff]  ;;  %v642_v50 = vld [vmem:[%s1458_s5 + $0x150] sm:$0xff]  ;;  %v643_v51 = vld [vmem:[%s1458_s5 + $0x158] sm:$0xff] }
  0x1d   : > { %1024 = vmatprep.subr.bf16.mxu0 %v1023_v36  ;;  %v640_v36 = vld [vmem:[%s1458_s5 + $0x140] sm:$0xff]  ;;  %v629_v53 = vld [vmem:[%s1458_s5 + $0xe8] sm:$0xff]  ;;  %v630_v2 = vld [vmem:[%s1458_s5 + $0xf0] sm:$0xff] }
  0x1e   : > { %v628_v52 = vld [vmem:[%s1458_s5 + $0xe0] sm:$0xff]  ;;  %v661_v55 = vld [vmem:[%s1458_s5 + $0x1e8] sm:$0xff]  ;;  %v631_v3 = vld [vmem:[%s1458_s5 + $0xf8] sm:$0xff] }
  0x1f   : > { %v660_v54 = vld [vmem:[%s1458_s5 + $0x1e0] sm:$0xff]  ;;  %v645_v0 = vld [vmem:[%s1458_s5 + $0x168] sm:$0xff]  ;;  %v662_v4 = vld [vmem:[%s1458_s5 + $0x1f0] sm:$0xff]  ;;  %v1019_v5 = vpack.c.bf16 %v631_v3, %v630_v2 }
  0x20   : > { %v1047_v59 = vpack.c.bf16 %v661_v55, %v660_v54  ;;  %v612_v60 = vld [vmem:[%s1458_s5 + $0x60] sm:$0xff]  ;;  %v615_v8 = vld [vmem:[%s1458_s5 + $0x78] sm:$0xff] }
  0x21   : > { %v647_v12 = vld [vmem:[%s1458_s5 + $0x178] sm:$0xff]  ;;  %v428_v15 = vld [vmem:[%s1457_s4] sm:$0xf] }
  0x22   : > { %v437_v20 = vrot.slane %v428_v15, %v436_v16  ;;  %v445_v21 = vrot.slane %v428_v15, %v444_v17 }
  0x93   : > { %v405_v46 = vpop.permute.xlu0 %404 }
  0x94   : > { %v410_v49 = vrot.slane %v405_v46, %v409_v45  ;;  %v610_v46 = vld [vmem:[%s1458_s5 + $0x50] sm:$0xff] }
  0xea   : > { %v388_v40 = vpop.f32.mrb[0].mxu0 }
  0xeb   : > { %v394_v41 = vadd.f32 %v388_v40, %v343_v38  ;;  %v973_v42 = vpop.f32.mrb[1].mxu0  ;;  %v626_v38 = vld [vmem:[%s1458_s5 + $0xd0] sm:$0xff]  ;;  %v627_v40 = vld [vmem:[%s1458_s5 + $0xd8] sm:$0xff] }
  0xec   : > { %v391_v43 = vpop.f32.mrb[2].mxu0  ;;  %v659_v42 = vld [vmem:[%s1458_s5 + $0x1d8] sm:$0xff]  ;;  %v1011_v48 = vpack.c.bf16 %v627_v40, %v626_v38 }
  0xed   : > { %396 = vst.msk [vmem:[#allocation2] sm:$0x1] %vm341_vm1, %v394_v41  ;;  %v974_v44 = vpop.f32.mrb[3].mxu0  ;;  %v658_v41 = vld [vmem:[%s1458_s5 + $0x1d0] sm:$0xff]  ;;  %v1009_v43 = vpack.c.bf16 %v609_v33, %v608_v32 }
  0xee   : > { %v1041_v44 = vpack.c.bf16 %v641_v37, %v640_v36 }
  0xf4   : > { %v401_v56 = vld [vmem:[#allocation2] sm:$0x1] }
  0xf5   : > { %v411_v61 = vmul.f32 %v410_v49, %v401_v56  ;;  %v1043_v49 = vpack.c.bf16 %v659_v42, %v658_v41  ;;  %v1013_v56 = vpack.c.bf16 %v611_v47, %v610_v46 }
  0xf7   : > { %893 = vmatmul.mubr.msk.f32.vlgmr.msra.gmra.mrb[0].mxu1 %vm450_vm4, %v411_v61  ;;  %894 = vmatmul.mubr.msk.f32.vlgmr.msra.gmra.mrb[4].mxu0 %vm450_vm4, %v411_v61  ;;  %v613_v61 = vld [vmem:[%s1458_s5 + $0x68] sm:$0xff] }
  0xf8   : > { %994 = vmatpush3.bf16.msra.mxu1 %v993_v57  ;;  %1026 = vmatpush3.bf16.msra.mxu0 %v1025_v58  ;;  %v1045_v57 = vpack.c.bf16 %v643_v51, %v642_v50  ;;  %v1015_v58 = vpack.c.bf16 %v629_v53, %v628_v52 }
  0xf9   : > { %996 = vmatprep.subr.bf16.mxu1 %v995_v62  ;;  %1028 = vmatprep.subr.bf16.mxu0 %v1027_v63  ;;  %v644_v62 = vld [vmem:[%s1458_s5 + $0x160] sm:$0xff]  ;;  %v1017_v63 = vpack.c.bf16 %v613_v61, %v612_v60 }
  0xfa   : > { %v1049_v1 = vpack.c.bf16 %v645_v0, %v644_v62 }
  0xfc   : > { %998 = vmatpush3.bf16.msra.mxu1 %v997_v6  ;;  %1030 = vmatpush3.bf16.msra.mxu0 %v1029_v7  ;;  %v663_v6 = vld [vmem:[%s1458_s5 + $0x1f8] sm:$0xff]  ;;  %v614_v7 = vld [vmem:[%s1458_s5 + $0x70] sm:$0xff] }
  0xfd   : > { %1000 = vmatprep.subr.bf16.mxu1 %v999_v10  ;;  %1032 = vmatprep.subr.bf16.mxu0 %v1031_v11  ;;  %v1051_v9 = vpack.c.bf16 %v663_v6, %v662_v4  ;;  %v1021_v10 = vpack.c.bf16 %v615_v8, %v614_v7  ;;  %v646_v11 = vld [vmem:[%s1458_s5 + $0x170] sm:$0xff] }
  0xfe   : > { %v1053_v13 = vpack.c.bf16 %v647_v12, %v646_v11 }
 0x100   : > { %1002 = vmatpush3.bf16.msra.mxu1 %v1001_v18  ;;  %1034 = vmatpush3.bf16.msra.mxu0 %v1033_v19  ;;  %v433_v18 = vrot.slane %v428_v15, %v409_v45  ;;  %v441_v19 = vrot.slane %v428_v15, %v440_v14 }
 0x101   : > { %1004 = vmatprep.subr.bf16.mxu1 %v1003_v22  ;;  %1036 = vmatprep.subr.bf16.mxu0 %v1035_v23 }
 0x104   : > { %1006 = vmatpush3.bf16.msra.mxu1 %v1005_v30  ;;  %1038 = vmatpush3.bf16.msra.mxu0 %v1037_v31 }
 0x105   : > { %1008 = vmatprep.subr.bf16.mxu1 %v1007_v34  ;;  %1040 = vmatprep.subr.bf16.mxu0 %v1039_v35  ;;  %v664_v34 = vld [vmem:[#allocation3] sm:$0x1] }
 0x108   : > { %1010 = vmatpush3.bf16.msra.mxu1 %v1009_v43  ;;  %1042 = vmatpush3.bf16.msra.mxu0 %v1041_v44 }
 0x109   : > { %1012 = vmatprep.subr.bf16.mxu1 %v1011_v48  ;;  %1044 = vmatprep.subr.bf16.mxu0 %v1043_v49 }
 0x10c   : > { %1014 = vmatpush3.bf16.msra.mxu1 %v1013_v56  ;;  %1046 = vmatpush3.bf16.msra.mxu0 %v1045_v57 }
 0x10d   : > { %1016 = vmatprep.subr.bf16.mxu1 %v1015_v58  ;;  %1048 = vmatprep.subr.bf16.mxu0 %v1047_v59 }
 0x110   : > { %1018 = vmatpush3.bf16.msra.mxu1 %v1017_v63  ;;  %1050 = vmatpush3.bf16.msra.mxu0 %v1049_v1 }
 0x111   : > { %1020 = vmatprep.subr.bf16.mxu1 %v1019_v5  ;;  %1052 = vmatprep.subr.bf16.mxu0 %v1051_v9 }
 0x114   : > { %1022 = vmatpush3.bf16.msra.mxu1 %v1021_v10  ;;  %1054 = vmatpush3.bf16.msra.mxu0 %v1053_v13 }
 0x1ca   : > { %v520_v22 = vpop.f32.mrb[0].mxu1  ;;  %v591_v23 = vpop.f32.mrb[4].mxu0 }
 0x1cb   : > { %v521_v24 = vadd.f32 %v520_v22, %v433_v18  ;;  %v592_v25 = vadd.f32 %v591_v23, %v441_v19  ;;  %v522_v26 = vpop.f32.mrb[1].mxu1  ;;  %v593_v27 = vpop.f32.mrb[5].mxu0 }
 0x1cc   : > { %v523_v28 = vadd.f32 %v522_v26, %v437_v20  ;;  %v594_v29 = vadd.f32 %v593_v27, %v445_v21 }
 0x1cd   : > { %v596_v32 = vmax.f32 %v521_v24, 0.0  ;;  %v598_v33 = vmax.f32 %v592_v25, 0.0 }
 0x1ce   : > { %v597_v30 = vmax.f32 %v523_v28, 0.0  ;;  %v599_v31 = vmax.f32 %v594_v29, 0.0 }
 0x1d0   : > { %729 = vmatprep.mubr.f32.mxu1 %v597_v30  ;;  %799 = vmatprep.mubr.f32.mxu0 %v599_v31 }
 0x1d1   : > { %730 = vmatmul.mubr.f32.vlgmr.msra.gmra.mrb[2].mxu1 %v596_v32  ;;  %800 = vmatmul.mubr.f32.vlgmr.msra.gmra.mrb[6].mxu0 %v598_v33 }
 0x2a4   : > { %v931_v39 = vpop.f32.mrb[2].mxu1  ;;  %v966_v45 = vpop.f32.mrb[6].mxu0 }
 0x2a5   : > { %v932_v35 = vpop.f32.mrb[3].mxu1  ;;  %v967_v36 = vpop.f32.mrb[7].mxu0 }
 0x2a6   : > { %v933_v37 = vadd.f32 %v932_v35, %v931_v39  ;;  %v968_v38 = vadd.f32 %v967_v36, %v966_v45 }
 0x2a8   : > { %v732_v40 = vadd.f32 %v933_v37, %v664_v34 }
 0x2aa   : > { %v802_v41 = vadd.f32 %v968_v38, %v732_v40 }
 0x2ac   : > { %806 = vst.msk [vmem:[%s335_s20] sm:$0x1] %vm805_vm5, %v802_v41 }
 0x2ad PF: > { %s19_s28 = sadd.s32 1, %s1105_s28   ;;  %s1461_s26 = smov %s1101_s27 }
 0x2ae   : > { %p16_p5 = scmp.ge.s32.totalorder %s19_s28, 4   ;;  %s1462_s27 = smov %s1464_s6 }
 0x2b0   :  { %18 = sbr.rel (!%p16_p5) target bundleno = 3 (0x3), region = 92 }

</bundles_post_ra>
